<compile_context>
chip_gen: v7x
topology: tpu7x:2x2x1
jax: 0.10.0
libtpu: 0.0.40
codegen_flags: <defaults>
</compile_context>

<pallas_src>
import math

import jax
import jax.numpy as jnp
from jax.experimental import pallas as pl
from jax.experimental.pallas import tpu as pltpu

HIGHEST = jax.lax.Precision.HIGHEST


# ----------------------------------------------------------------------------
# Kernel 1a: A(p) full MLP + B(p) MLP up to its last hidden layer (all in VMEM)
# ----------------------------------------------------------------------------
def ab_hidden_kernel(p_ref, *refs):
    """a_out = A_net(p).ravel();  b_hid = LeakyReLU stack of B_net's first 3 layers."""
    a_wb = refs[0:6]          # A-net: 3 x (w, b), w stored as (in, out)
    b_wb = refs[6:12]         # B-net: first 3 layers x (w, b)
    a_out_ref = refs[12]      # (1, D*D)
    b_hid_ref = refs[13]      # (1, D**3 // 2)

    def mlp(x, wb_refs):
        h = x
        for i in range(0, len(wb_refs), 2):
            w = wb_refs[i][...]
            b = wb_refs[i + 1][...]
            h = jnp.dot(h, w, preferred_element_type=jnp.float32) + b
            h = jnp.where(h > 0, h, 0.2 * h)          # LeakyReLU(0.2)
        return h

    p = p_ref[...]                                     # (1, p_dim)
    a_out_ref[...] = mlp(p, a_wb)
    b_hid_ref[...] = mlp(p, b_wb)


# ----------------------------------------------------------------------------
# Kernel 1b: B(p) final layer, column-tiled so the (D^3//2, D^3) weight streams
# ----------------------------------------------------------------------------
def b_out_kernel(h_ref, w_ref, b_ref, o_ref):
    y = jnp.dot(h_ref[...], w_ref[...], preferred_element_type=jnp.float32) + b_ref[...]
    o_ref[...] = jnp.where(y > 0, y, 0.2 * y)          # LeakyReLU(0.2)


# ----------------------------------------------------------------------------
# Kernel 2: g(z) = A z + B z z, batch on the lane axis (one tile per grid step)
# ----------------------------------------------------------------------------
def g_kernel(z_ref, r0_ref, mj_ref, t0_ref, mk_ref, wt_ref, o_ref):
    """out^T = W^T @ [(R0 @ z^T + mj) * (T0 @ z^T + mk)].

    z_ref  : (bt, D)        state tile (natural layout, no wrapper concat/transpose)
    r0_ref : (F, D)         F = (D+1)^2; row (j,k) = e_{j-1} for j>=1, 0 for j=0
    mj_ref : (F, 1)         1 where j == 0 (the folded "ones column")
    t0_ref : (F, D)         row (j,k) = e_{k-1} for k>=1, 0 for k=0
    mk_ref : (F, 1)         1 where k == 0
    wt_ref : (D, F)         packed [A | B] weight, see gnn_build_weight
    o_ref  : (D, bt)        lane-dense output tile (batch on lanes)
    """
    zt = z_ref[...].T                                        # (D, bt): batch -> lanes
    zj = jnp.dot(r0_ref[...], zt, preferred_element_type=jnp.float32) + mj_ref[...]
    zk = jnp.dot(t0_ref[...], zt, preferred_element_type=jnp.float32) + mk_ref[...]
    feat = zj * zk                                           # feat[(j,k),b] = z_aug_j * z_aug_k
    o_ref[...] = jnp.dot(wt_ref[...], feat,
                         preferred_element_type=jnp.float32).astype(o_ref.dtype)


# ----------------------------------------------------------------------------
# Parameter construction (mirrors the torch module; weights stored as (in, out))
# ----------------------------------------------------------------------------
def init_gnn_params(key, p_dim, z_dim):
    D = z_dim

    def linear(k, fan_in, fan_out):
        kw, kb = jax.random.split(k)
        lim = 1.0 / math.sqrt(fan_in)
        w = jax.random.uniform(kw, (fan_in, fan_out), jnp.float32, -lim, lim)
        b = jax.random.uniform(kb, (1, fan_out), jnp.float32, -lim, lim)
        return w, b

    # A-net: p_dim -> D -> D^2//2 -> D^2
    a_dims = [p_dim, D, (D * D) // 2, D * D]
    # B-net: p_dim -> D -> int(sqrt(D^3)) -> D^3//2 -> D^3
    b_dims = [p_dim, D, int(math.sqrt(D ** 3)), (D ** 3) // 2, D ** 3]

    keys = jax.random.split(key, len(a_dims) - 1 + len(b_dims) - 1)
    a_layers = [linear(keys[i], a_dims[i], a_dims[i + 1]) for i in range(3)]
    b_layers = [linear(keys[3 + i], b_dims[i], b_dims[i + 1]) for i in range(4)]

    # Special init of A.layer_out: zero weight, bias = diag(-ones(D)).ravel()
    a_layers[2] = (jnp.zeros((a_dims[2], a_dims[3]), jnp.float32),
                   (-jnp.eye(D, dtype=jnp.float32)).reshape(1, D * D))

    # Constant expanders / masks (depend only on D -> built once, reused).
    Daug = D + 1
    eye_aug = jnp.eye(Daug, dtype=jnp.float32)[:, 1:]         # (Daug, D)
    R0 = jnp.repeat(eye_aug, Daug, axis=0)                    # (F, D) row (j,k) -> e_{j-1}
    T0 = jnp.tile(eye_aug, (Daug, 1))                         # (F, D) row (j,k) -> e_{k-1}
    idx = jnp.arange(Daug * Daug)
    mj = (idx // Daug == 0).astype(jnp.float32).reshape(-1, 1)  # ones column for j
    mk = (idx % Daug == 0).astype(jnp.float32).reshape(-1, 1)   # ones column for k

    return {"z_dim": D, "p_dim": p_dim,
            "a_layers": a_layers, "b_layers": b_layers,
            "R0": R0, "T0": T0, "mj": mj, "mk": mk}


# ----------------------------------------------------------------------------
# Weight builder (once per p): run the A/B MLP kernels and pack W^T = (D, F)
# ----------------------------------------------------------------------------
def _b_out_col_tile(ncols, nrows):
    """Largest multiple-of-128 divisor of ncols whose (nrows, ct) f32 weight
    strip stays <= ~2 MiB double-buffered; full width if ncols isn't aligned."""
    if ncols % 128 != 0:
        return ncols
    budget = 4 * 1024 * 1024
    best = 128
    c = 128
    while c <= ncols:
        if ncols % c == 0 and 2 * nrows * c * 4 <= budget:
            best = c
        c += 128
    return best


def gnn_build_weight(params, p):
    """Run A(p)/B(p) and pack W^T[i, j*(D+1)+k] = {A[i,k-1] if j==0, B[i,j-1,k-1] if j,k>=1}.

    For an ODE integration with fixed p, call this ONCE and reuse W^T for every
    gnn_apply step (the per-step hot path never touches the MLPs).
    """
    D = params["z_dim"]
    H3 = (D ** 3) // 2
    F3 = D ** 3
    p2 = jnp.asarray(p, jnp.float32).reshape(1, -1)

    flat_a = [x for wb in params["a_layers"] for x in wb]
    flat_b3 = [x for wb in params["b_layers"][:3] for x in wb]

    a_flat, b_hid = pl.pallas_call(
        ab_hidden_kernel,
        out_shape=(jax.ShapeDtypeStruct((1, D * D), jnp.float32),
                   jax.ShapeDtypeStruct((1, H3), jnp.float32)),
    )(p2, *flat_a, *flat_b3)

    # B-net final layer, column-tiled (keeps the 2*D^6-byte weight out of VMEM
    # as D grows; at D=8 this is a single tile).
    w_out, b_out = params["b_layers"][3]
    ct = _b_out_col_tile(F3, H3)
    b_flat = pl.pallas_call(
        b_out_kernel,
        out_shape=jax.ShapeDtypeStruct((1, F3), jnp.float32),
        grid_spec=pltpu.PrefetchScalarGridSpec(
            num_scalar_prefetch=0,
            grid=(F3 // ct,),
            in_specs=[
                pl.BlockSpec((1, H3), lambda i: (0, 0)),    # hidden activations (resident)
                pl.BlockSpec((H3, ct), lambda i: (0, i)),   # weight column strip
                pl.BlockSpec((1, ct), lambda i: (0, i)),    # bias strip
            ],
            out_specs=pl.BlockSpec((1, ct), lambda i: (0, i)),
        ),
        compiler_params=pltpu.CompilerParams(
            dimension_semantics=("parallel",)),
    )(b_hid, w_out, b_out)

    A = a_flat.reshape(D, D)          # natural (i, j) order
    B = b_flat.reshape(D, D, D)       # natural (i, j, k) order
    # W^T as (D, Daug, Daug): j=0 row -> [0 | A[i,:]], j>=1 rows -> [0 | B[i,j-1,:]]
    top = jnp.pad(A[:, None, :], ((0, 0), (0, 0), (1, 0)))   # (D, 1, Daug)
    bot = jnp.pad(B, ((0, 0), (0, 0), (1, 0)))               # (D, D, Daug)
    Daug = D + 1
    return jnp.concatenate([top, bot], axis=1).reshape(D, Daug * Daug)


# ----------------------------------------------------------------------------
# Per-step application (hot path)
# ----------------------------------------------------------------------------
def _pick_bt(batch):
    # Split the batch over two grid programs only when each half still keeps a
    # 128-lane-aligned output tile (fills the MXU and uses both TCs on v7x).
    # On single-TC v5e/v6e a split only adds ~0.35us, so keep one tile otherwise.
    if batch >= 256 and batch % 256 == 0:
        return batch // 2
    return batch


def gnn_apply(z, WT, params, *, bt=None, transpose_out=True):
    """Evaluate A z + B z z given the packed weight W^T (shape (D, (D+1)^2)).

    Callers amortizing fixed launch overhead should stack RK substeps /
    trajectories along the batch axis of `z` and reuse WT across steps.
    """
    batch, D = z.shape
    Daug = D + 1
    F = Daug * Daug
    R0, T0, mj, mk = params["R0"], params["T0"], params["mj"], params["mk"]
    assert WT.shape == (D, F) and R0.shape == (F, D) and T0.shape == (F, D)

    if bt is None:
        bt = _pick_bt(batch)
    assert batch % bt == 0, "batch must be divisible by the tile size bt"
    assert bt == batch or bt % 128 == 0, "split tiles must be 128-lane aligned"

    z32 = z.astype(jnp.float32)

    cost = pl.CostEstimate(
        flops=int(6 * batch * F * D + 3 * batch * F),
        transcendentals=0,
        bytes_accessed=int(4 * (batch * D + 2 * F * D + 2 * F + D * F + D * batch)),
    )

    out_t = pl.pallas_call(
        g_kernel,
        out_shape=jax.ShapeDtypeStruct((D, batch), jnp.float32),   # lane-dense output
        grid_spec=pltpu.PrefetchScalarGridSpec(
            num_scalar_prefetch=0,
            grid=(batch // bt,),
            in_specs=[
                pl.BlockSpec((bt, D), lambda i: (i, 0)),     # z tile (natural layout)
                pl.BlockSpec((F, D), lambda i: (0, 0)),      # R0 (resident constant)
                pl.BlockSpec((F, 1), lambda i: (0, 0)),      # mj
                pl.BlockSpec((F, D), lambda i: (0, 0)),      # T0
                pl.BlockSpec((F, 1), lambda i: (0, 0)),      # mk
                pl.BlockSpec((D, F), lambda i: (0, 0)),      # W^T
            ],
            out_specs=pl.BlockSpec((D, bt), lambda i: (0, i)),
        ),
        compiler_params=pltpu.CompilerParams(
            dimension_semantics=("parallel",)),
        cost_estimate=cost,
    )(z32, R0, mj, T0, mk, WT)

    # Module semantics return (batch, D); ODE callers that can consume the
    # lane-dense (D, batch) layout directly should pass transpose_out=False.
    return out_t.T if transpose_out else out_t


def gnn_forward(t, z, p, params, *, bt=None):
    """Faithful Gnn.forward(t, z, p): recomputes A(p), B(p) every call.

    For a fixed p across many ODE steps, hoist gnn_build_weight out of the
    solver loop and call gnn_apply directly per step.
    """
    del t  # unused, as in the torch module
    WT = gnn_build_weight(params, p)
    return gnn_apply(z, WT, params, bt=bt)


# ----------------------------------------------------------------------------
# Pure-JAX reference (mirrors the PyTorch module exactly, HIGHEST precision)
# ----------------------------------------------------------------------------
def gnn_reference(t, z, p, params):
    del t
    D = params["z_dim"]

    def leaky(x):
        return jnp.where(x > 0, x, 0.2 * x)

    def mlp(x, layers):
        h = x
        for w, b in layers:
            h = leaky(jnp.dot(h, w, precision=HIGHEST) + b)
        return h

    p2 = jnp.asarray(p, jnp.float32).reshape(1, -1)
    A = mlp(p2, params["a_layers"]).reshape(D, D)
    B = mlp(p2, params["b_layers"]).reshape(D, D, D)
    lin = jnp.einsum('ij,bj->bi', A, z, precision=HIGHEST)
    quad = jnp.einsum('ijk,bj,bk->bi', B, z, z, precision=HIGHEST)
    return lin + quad


if __name__ == "__main__":
    key = jax.random.PRNGKey(0)
    p_dim, z_dim, batch = 4, 8, 64

    kparams, kp, kz = jax.random.split(key, 3)
    params = init_gnn_params(kparams, p_dim, z_dim)
    p = jax.random.normal(kp, (p_dim,), dtype=jnp.float32)
    z = jax.random.normal(kz, (batch, z_dim), dtype=jnp.float32)
    t = 0.0  # unused, kept for forward-signature fidelity

    out = gnn_forward(t, z, p, params)
    out = jax.block_until_ready(out)

    ref = gnn_reference(t, z, p, params)
    assert out.shape == (batch, z_dim)
    err = float(jnp.max(jnp.abs(out - ref)))
    assert jnp.allclose(out, ref, rtol=1e-4, atol=1e-3), f"max abs err {err}"

    print("KERNEL_OK")
</pallas_src>

<mosaic_0001>
module attributes {stable_mosaic.version = 11 : i64} {
  func.func @ab_hidden_kernel(%arg0: memref<1x4xf32, #tpu.memory_space<vmem>>, %arg1: memref<4x8xf32, #tpu.memory_space<vmem>>, %arg2: memref<1x8xf32, #tpu.memory_space<vmem>>, %arg3: memref<8x32xf32, #tpu.memory_space<vmem>>, %arg4: memref<1x32xf32, #tpu.memory_space<vmem>>, %arg5: memref<32x64xf32, #tpu.memory_space<vmem>>, %arg6: memref<1x64xf32, #tpu.memory_space<vmem>>, %arg7: memref<4x8xf32, #tpu.memory_space<vmem>>, %arg8: memref<1x8xf32, #tpu.memory_space<vmem>>, %arg9: memref<8x22xf32, #tpu.memory_space<vmem>>, %arg10: memref<1x22xf32, #tpu.memory_space<vmem>>, %arg11: memref<22x256xf32, #tpu.memory_space<vmem>>, %arg12: memref<1x256xf32, #tpu.memory_space<vmem>>, %arg13: memref<1x64xf32, #tpu.memory_space<vmem>>, %arg14: memref<1x256xf32, #tpu.memory_space<vmem>>) attributes {dimension_semantics = [], scalar_prefetch = 0 : i64, scratch_operands = 0 : i64, tpu.core_type = #tpu.core_type<tc>} {
    %c0 = arith.constant 0 : index
    %c0_0 = arith.constant 0 : index
    %0 = vector.load %arg0[%c0, %c0_0] : memref<1x4xf32, #tpu.memory_space<vmem>>, vector<1x4xf32>
    %c0_1 = arith.constant 0 : index
    %c0_2 = arith.constant 0 : index
    %1 = vector.load %arg1[%c0_1, %c0_2] : memref<4x8xf32, #tpu.memory_space<vmem>>, vector<4x8xf32>
    %c0_3 = arith.constant 0 : index
    %c0_4 = arith.constant 0 : index
    %2 = vector.load %arg2[%c0_3, %c0_4] : memref<1x8xf32, #tpu.memory_space<vmem>>, vector<1x8xf32>
    %cst = arith.constant dense<0.000000e+00> : vector<1x8xf32>
    %3 = tpu.matmul %0, %1, %cst {dimension_numbers = #tpu.dot_dimension_numbers<[1], [0], [0], [1], [0, 0, 1, 1], [], []>} : vector<1x4xf32>, vector<4x8xf32>, vector<1x8xf32> -> vector<1x8xf32>
    %4 = arith.addf %3, %2 : vector<1x8xf32>
    %cst_5 = arith.constant 0.000000e+00 : f32
    %5 = vector.broadcast %cst_5 : f32 to vector<1x8xf32>
    %6 = arith.cmpf ogt, %4, %5 : vector<1x8xf32>
    %cst_6 = arith.constant 2.000000e-01 : f32
    %7 = vector.broadcast %cst_6 : f32 to vector<1x8xf32>
    %8 = arith.mulf %7, %4 : vector<1x8xf32>
    %9 = arith.select %6, %4, %8 : vector<1x8xi1>, vector<1x8xf32>
    %c0_7 = arith.constant 0 : index
    %c0_8 = arith.constant 0 : index
    %10 = vector.load %arg3[%c0_7, %c0_8] : memref<8x32xf32, #tpu.memory_space<vmem>>, vector<8x32xf32>
    %c0_9 = arith.constant 0 : index
    %c0_10 = arith.constant 0 : index
    %11 = vector.load %arg4[%c0_9, %c0_10] : memref<1x32xf32, #tpu.memory_space<vmem>>, vector<1x32xf32>
    %cst_11 = arith.constant dense<0.000000e+00> : vector<1x32xf32>
    %12 = tpu.matmul %9, %10, %cst_11 {dimension_numbers = #tpu.dot_dimension_numbers<[1], [0], [0], [1], [0, 0, 1, 1], [], []>} : vector<1x8xf32>, vector<8x32xf32>, vector<1x32xf32> -> vector<1x32xf32>
    %13 = arith.addf %12, %11 : vector<1x32xf32>
    %cst_12 = arith.constant 0.000000e+00 : f32
    %14 = vector.broadcast %cst_12 : f32 to vector<1x32xf32>
    %15 = arith.cmpf ogt, %13, %14 : vector<1x32xf32>
    %cst_13 = arith.constant 2.000000e-01 : f32
    %16 = vector.broadcast %cst_13 : f32 to vector<1x32xf32>
    %17 = arith.mulf %16, %13 : vector<1x32xf32>
    %18 = arith.select %15, %13, %17 : vector<1x32xi1>, vector<1x32xf32>
    %c0_14 = arith.constant 0 : index
    %c0_15 = arith.constant 0 : index
    %19 = vector.load %arg5[%c0_14, %c0_15] : memref<32x64xf32, #tpu.memory_space<vmem>>, vector<32x64xf32>
    %c0_16 = arith.constant 0 : index
    %c0_17 = arith.constant 0 : index
    %20 = vector.load %arg6[%c0_16, %c0_17] : memref<1x64xf32, #tpu.memory_space<vmem>>, vector<1x64xf32>
    %cst_18 = arith.constant dense<0.000000e+00> : vector<1x64xf32>
    %21 = tpu.matmul %18, %19, %cst_18 {dimension_numbers = #tpu.dot_dimension_numbers<[1], [0], [0], [1], [0, 0, 1, 1], [], []>} : vector<1x32xf32>, vector<32x64xf32>, vector<1x64xf32> -> vector<1x64xf32>
    %22 = arith.addf %21, %20 : vector<1x64xf32>
    %cst_19 = arith.constant 0.000000e+00 : f32
    %23 = vector.broadcast %cst_19 : f32 to vector<1x64xf32>
    %24 = arith.cmpf ogt, %22, %23 : vector<1x64xf32>
    %cst_20 = arith.constant 2.000000e-01 : f32
    %25 = vector.broadcast %cst_20 : f32 to vector<1x64xf32>
    %26 = arith.mulf %25, %22 : vector<1x64xf32>
    %27 = arith.select %24, %22, %26 : vector<1x64xi1>, vector<1x64xf32>
    %c0_21 = arith.constant 0 : index
    %c0_22 = arith.constant 0 : index
    %28 = vector.load %arg13[%c0_21, %c0_22] : memref<1x64xf32, #tpu.memory_space<vmem>>, vector<1x64xf32>
    tpu.vector_store %arg13[%c0_21, %c0_22], %27 {strides = array<i32>} : memref<1x64xf32, #tpu.memory_space<vmem>>, vector<1x64xf32>,
    %c0_23 = arith.constant 0 : index
    %c0_24 = arith.constant 0 : index
    %29 = vector.load %arg7[%c0_23, %c0_24] : memref<4x8xf32, #tpu.memory_space<vmem>>, vector<4x8xf32>
    %c0_25 = arith.constant 0 : index
    %c0_26 = arith.constant 0 : index
    %30 = vector.load %arg8[%c0_25, %c0_26] : memref<1x8xf32, #tpu.memory_space<vmem>>, vector<1x8xf32>
    %cst_27 = arith.constant dense<0.000000e+00> : vector<1x8xf32>
    %31 = tpu.matmul %0, %29, %cst_27 {dimension_numbers = #tpu.dot_dimension_numbers<[1], [0], [0], [1], [0, 0, 1, 1], [], []>} : vector<1x4xf32>, vector<4x8xf32>, vector<1x8xf32> -> vector<1x8xf32>
    %32 = arith.addf %31, %30 : vector<1x8xf32>
    %cst_28 = arith.constant 0.000000e+00 : f32
    %33 = vector.broadcast %cst_28 : f32 to vector<1x8xf32>
    %34 = arith.cmpf ogt, %32, %33 : vector<1x8xf32>
    %cst_29 = arith.constant 2.000000e-01 : f32
    %35 = vector.broadcast %cst_29 : f32 to vector<1x8xf32>
    %36 = arith.mulf %35, %32 : vector<1x8xf32>
    %37 = arith.select %34, %32, %36 : vector<1x8xi1>, vector<1x8xf32>
    %c0_30 = arith.constant 0 : index
    %c0_31 = arith.constant 0 : index
    %38 = vector.load %arg9[%c0_30, %c0_31] : memref<8x22xf32, #tpu.memory_space<vmem>>, vector<8x22xf32>
    %c0_32 = arith.constant 0 : index
    %c0_33 = arith.constant 0 : index
    %39 = vector.load %arg10[%c0_32, %c0_33] : memref<1x22xf32, #tpu.memory_space<vmem>>, vector<1x22xf32>
    %cst_34 = arith.constant dense<0.000000e+00> : vector<1x22xf32>
    %40 = tpu.matmul %37, %38, %cst_34 {dimension_numbers = #tpu.dot_dimension_numbers<[1], [0], [0], [1], [0, 0, 1, 1], [], []>} : vector<1x8xf32>, vector<8x22xf32>, vector<1x22xf32> -> vector<1x22xf32>
    %41 = arith.addf %40, %39 : vector<1x22xf32>
    %cst_35 = arith.constant 0.000000e+00 : f32
    %42 = vector.broadcast %cst_35 : f32 to vector<1x22xf32>
    %43 = arith.cmpf ogt, %41, %42 : vector<1x22xf32>
    %cst_36 = arith.constant 2.000000e-01 : f32
    %44 = vector.broadcast %cst_36 : f32 to vector<1x22xf32>
    %45 = arith.mulf %44, %41 : vector<1x22xf32>
    %46 = arith.select %43, %41, %45 : vector<1x22xi1>, vector<1x22xf32>
    %c0_37 = arith.constant 0 : index
    %c0_38 = arith.constant 0 : index
    %47 = vector.load %arg11[%c0_37, %c0_38] : memref<22x256xf32, #tpu.memory_space<vmem>>, vector<22x256xf32>
    %c0_39 = arith.constant 0 : index
    %c0_40 = arith.constant 0 : index
    %48 = vector.load %arg12[%c0_39, %c0_40] : memref<1x256xf32, #tpu.memory_space<vmem>>, vector<1x256xf32>
    %cst_41 = arith.constant dense<0.000000e+00> : vector<1x256xf32>
    %49 = tpu.matmul %46, %47, %cst_41 {dimension_numbers = #tpu.dot_dimension_numbers<[1], [0], [0], [1], [0, 0, 1, 1], [], []>} : vector<1x22xf32>, vector<22x256xf32>, vector<1x256xf32> -> vector<1x256xf32>
    %50 = arith.addf %49, %48 : vector<1x256xf32>
    %cst_42 = arith.constant 0.000000e+00 : f32
    %51 = vector.broadcast %cst_42 : f32 to vector<1x256xf32>
    %52 = arith.cmpf ogt, %50, %51 : vector<1x256xf32>
    %cst_43 = arith.constant 2.000000e-01 : f32
    %53 = vector.broadcast %cst_43 : f32 to vector<1x256xf32>
    %54 = arith.mulf %53, %50 : vector<1x256xf32>
    %55 = arith.select %52, %50, %54 : vector<1x256xi1>, vector<1x256xf32>
    %c0_44 = arith.constant 0 : index
    %c0_45 = arith.constant 0 : index
    %56 = vector.load %arg14[%c0_44, %c0_45] : memref<1x256xf32, #tpu.memory_space<vmem>>, vector<1x256xf32>
    tpu.vector_store %arg14[%c0_44, %c0_45], %55 {strides = array<i32>} : memref<1x256xf32, #tpu.memory_space<vmem>>, vector<1x256xf32>,
    return
  }
}

</mosaic_0001>

<bundles_post_ra>
// kernel: tpu_custom_call.1
= control target key start
LH: loop header
LB: loop body
LE: loop exit
PB: predicated region body
PF: predicated region fallthrough
CT: control target
= control target key end

     0   :  { %20 = vsyncpa [#allocation3], 0  ;;  %s1224_s0 = inlined_call_operand.hbm [shape: f32[1,4], index: 0, kind: input, shape index: {}]   ;;  %s1225_s1 = inlined_call_operand.hbm [shape: f32[4,8], index: 1, kind: input, shape index: {}]   ;;  %s1226_s2 = inlined_call_operand.hbm [shape: f32[1,8], index: 2, kind: input, shape index: {}]   ;;  %s1227_s3 = inlined_call_operand.vmem [shape: f32[8,32], index: 3, kind: input, shape index: {}]   ;;  %s1228_s4 = inlined_call_operand.hbm [shape: f32[1,32], index: 4, kind: input, shape index: {}]   ;;  %s1229_s5 = inlined_call_operand.hbm [shape: f32[32,64], index: 5, kind: input, shape index: {}]   ;;  %s1230_s6 = inlined_call_operand.hbm [shape: f32[1,64], index: 6, kind: input, shape index: {}]   ;;  %s1231_s7 = inlined_call_operand.vmem [shape: f32[4,8], index: 7, kind: input, shape index: {}]   ;;  %s1232_s8 = inlined_call_operand.vmem [shape: f32[1,8], index: 8, kind: input, shape index: {}]   ;;  %s1233_s9 = inlined_call_operand.vmem [shape: f32[8,22], index: 9, kind: input, shape index: {}]   ;;  %s1234_s10 = inlined_call_operand.vmem [shape: f32[1,22], index: 10, kind: input, shape index: {}]   ;;  %s1235_s11 = inlined_call_operand.hbm [shape: f32[22,256], index: 11, kind: input, shape index: {}]   ;;  %s1236_s12 = inlined_call_operand.vmem [shape: f32[1,256], index: 12, kind: input, shape index: {}]   ;;  %s1237_s13 = inlined_call_operand.hbm [shape: f32[1,64], index: 13, kind: output, shape index: {0}]   ;;  %s1238_s14 = inlined_call_operand.hbm [shape: f32[1,256], index: 14, kind: output, shape index: {1}]  }
   0x1   :  { %21 = vsyncpa [#allocation6], 0 }
   0x2   :  { %22 = vsyncpa [#allocation9], 0 }
   0x3   :  { %23 = vsyncpa [#allocation12], 0 }
   0x4   :  { %24 = vsyncpa [#allocation4], 0 }
   0x5   :  { %25 = vsyncpa [#allocation16], 0  ;;  %s988_s29 = smov [#allocation5]   ;;  %s989_s15 = smov [#allocation8]  }
   0x6   :  { %s42_s30 = sshll.u32 %s988_s29, 4  ;;  %s64_s16 = sshll.u32 %s989_s15, 4  ;;  %s43_s30 = int_to_ptr.vmem [resolvable:$true] %s42_s30  ;;  %s65_s16 = int_to_ptr.vmem [resolvable:$true] %s64_s16 }
   0x7   :  { %s778_s19 = scalar_lea.hbm %s1225_s1, 64 }
   0x8   :  { %p779_p0 = scmp.ne.s32.totalorder %s1225_s1, %s778_s19  ;;  %p782_p1 = scmp.lt.u32.totalorder %s778_s19, %s1225_s1 }
   0xa   :  { %p784_p2 = pnand %p782_p1, %p779_p0 }
   0xc   :  { %787 = shalt.err (!%p784_p2)
}
   0xd   :  { %s788_s24 = scalar_lea.vmem %s43_s30, 64  ;;  %p793_p4 = scmp.lt.s32.totalorder %s43_s30, %s43_s30 }
   0xe   :  { %p789_p3 = scmp.ne.s32.totalorder %s43_s30, %s788_s24  ;;  %p794_p5 = scmp.lt.s32.totalorder %s788_s24, %s788_s24 }
  0x10   :  { %p795_p6 = por %p794_p5, %p793_p4 }
  0x12   :  { %p796_p7 = pnand %p795_p6, %p789_p3 }
  0x14   :  { %799 = shalt.err (!%p796_p7)
}
  0x15   :  { %45 = dma.hbm_to_vmem [thread:$0]  %s1225_s1, 64, %s43_s30, [#allocation6]  }
  0x16   :  { %s800_s29 = scalar_lea.hbm %s1228_s4, 16 }
  0x17   :  { %p801_p8 = scmp.ne.s32.totalorder %s1228_s4, %s800_s29  ;;  %p804_p9 = scmp.lt.u32.totalorder %s800_s29, %s1228_s4 }
  0x19   :  { %p806_p10 = pnand %p804_p9, %p801_p8 }
  0x1b   :  { %809 = shalt.err (!%p806_p10)
}
  0x1c   :  { %s810_s20 = scalar_lea.vmem %s65_s16, 16  ;;  %s814_s21 = scalar_lea.vmem %s65_s16, 32 }
  0x1d   :  { %p811_p11 = scmp.ne.s32.totalorder %s65_s16, %s810_s20  ;;  %p815_p12 = scmp.lt.s32.totalorder %s65_s16, %s65_s16 }
  0x1e   :  { %p816_p13 = scmp.lt.s32.totalorder %s814_s21, %s810_s20 }
  0x20   :  { %p817_p0 = por %p816_p13, %p815_p12 }
  0x22   :  { %p818_p1 = pnand %p817_p0, %p811_p11 }
  0x24   :  { %821 = shalt.err (!%p818_p1)
}
  0x25   :  { %67 = dma.hbm_to_vmem [thread:$0]  %s1228_s4, 16, %s65_s16, [#allocation9]  }
  0x26   :  { %s990_s22 = smov [#allocation11]   ;;  %s991_s24 = smov [#allocation2]  }
  0x27   :  { %s86_s23 = sshll.u32 %s990_s22, 4  ;;  %s32_s25 = sshll.u32 %s991_s24, 4  ;;  %s87_s23 = int_to_ptr.vmem [resolvable:$true] %s86_s23  ;;  %s33_s25 = int_to_ptr.vmem [resolvable:$true] %s32_s25 }
  0x28   :  { %s822_s28 = scalar_lea.hbm %s1230_s6, 16 }
  0x29   :  { %p823_p2 = scmp.ne.s32.totalorder %s1230_s6, %s822_s28  ;;  %p826_p3 = scmp.lt.u32.totalorder %s822_s28, %s1230_s6 }
  0x2b   :  { %p828_p4 = pnand %p826_p3, %p823_p2 }
  0x2d   :  { %831 = shalt.err (!%p828_p4)
}
  0x2e   :  { %s832_s4 = scalar_lea.vmem %s87_s23, 16  ;;  %s836_s16 = scalar_lea.vmem %s87_s23, 32 }
  0x2f   :  { %p833_p5 = scmp.ne.s32.totalorder %s87_s23, %s832_s4  ;;  %p837_p6 = scmp.lt.s32.totalorder %s87_s23, %s87_s23 }
  0x30   :  { %p838_p7 = scmp.lt.s32.totalorder %s836_s16, %s832_s4 }
  0x32   :  { %p839_p8 = por %p838_p7, %p837_p6 }
  0x34   :  { %p840_p9 = pnand %p839_p8, %p833_p5 }
  0x36   :  { %843 = shalt.err (!%p840_p9)
}
  0x37   :  { %89 = dma.hbm_to_vmem [thread:$0]  %s1230_s6, 16, %s87_s23, [#allocation12]  }
  0x38   :  { %s844_s30 = scalar_lea.hbm %s1224_s0, 16 }
  0x39   :  { %p845_p10 = scmp.ne.s32.totalorder %s1224_s0, %s844_s30  ;;  %p848_p11 = scmp.lt.u32.totalorder %s844_s30, %s1224_s0 }
  0x3b   :  { %p850_p12 = pnand %p848_p11, %p845_p10 }
  0x3d   :  { %853 = shalt.err (!%p850_p12)
}
  0x3e   :  { %s854_s28 = scalar_lea.vmem %s33_s25, 16  ;;  %s858_s29 = scalar_lea.vmem %s33_s25, 32 }
  0x3f   :  { %p855_p13 = scmp.ne.s32.totalorder %s33_s25, %s854_s28  ;;  %p859_p0 = scmp.lt.s32.totalorder %s33_s25, %s33_s25 }
  0x40   :  { %p860_p1 = scmp.lt.s32.totalorder %s858_s29, %s854_s28 }
  0x42   :  { %p861_p2 = por %p860_p1, %p859_p0 }
  0x44   :  { %p862_p3 = pnand %p861_p2, %p855_p13 }
  0x46   :  { %865 = shalt.err (!%p862_p3)
}
  0x47   :  { %35 = dma.hbm_to_vmem [thread:$0]  %s1224_s0, 16, %s33_s25, [#allocation3]  }
  0x48   :  { %s992_s15 = smov [#allocation7]   ;;  %s993_s18 = smov [#allocation10]  }
  0x49   :  { %s52_s17 = sshll.u32 %s992_s15, 4  ;;  %s73_s4 = sshll.u32 %s993_s18, 4  ;;  %s53_s17 = int_to_ptr.vmem [resolvable:$true] %s52_s17  ;;  %s1128_s4 = int_to_ptr.vmem [resolvable:$true] %s73_s4 }
  0x4a   :  { %s866_s20 = scalar_lea.hbm %s1226_s2, 16 }
  0x4b   :  { %p867_p4 = scmp.ne.s32.totalorder %s1226_s2, %s866_s20  ;;  %p870_p5 = scmp.lt.u32.totalorder %s866_s20, %s1226_s2 }
  0x4d   :  { %p872_p6 = pnand %p870_p5, %p867_p4 }
  0x4f   :  { %875 = shalt.err (!%p872_p6)
}
  0x50   :  { %s876_s0 = scalar_lea.vmem %s53_s17, 16  ;;  %s880_s25 = scalar_lea.vmem %s53_s17, 32 }
  0x51   :  { %p877_p7 = scmp.ne.s32.totalorder %s53_s17, %s876_s0  ;;  %p881_p8 = scmp.lt.s32.totalorder %s53_s17, %s53_s17 }
  0x52   :  { %p882_p9 = scmp.lt.s32.totalorder %s880_s25, %s876_s0 }
  0x54   :  { %p883_p10 = por %p882_p9, %p881_p8 }
  0x56   :  { %p884_p11 = pnand %p883_p10, %p877_p7 }
  0x58   :  { %887 = shalt.err (!%p884_p11)
}
  0x59   :  { %55 = dma.hbm_to_vmem [thread:$0]  %s1226_s2, 16, %s53_s17, [#allocation6]  }
  0x5a   :  { %s888_s29 = scalar_lea.hbm %s1229_s5, 512 }
  0x5b   :  { %p889_p12 = scmp.ne.s32.totalorder %s1229_s5, %s888_s29  ;;  %p892_p13 = scmp.lt.u32.totalorder %s888_s29, %s1229_s5 }
  0x5d   :  { %p894_p0 = pnand %p892_p13, %p889_p12 }
  0x5f   :  { %897 = shalt.err (!%p894_p0)
}
  0x60   :  { %s898_s16 = scalar_lea.vmem %s1128_s4, 512  ;;  %p903_p2 = scmp.lt.s32.totalorder %s1128_s4, %s1128_s4 }
  0x61   :  { %p899_p1 = scmp.ne.s32.totalorder %s1128_s4, %s898_s16  ;;  %p904_p3 = scmp.lt.s32.totalorder %s898_s16, %s898_s16 }
  0x63   :  { %p905_p4 = por %p904_p3, %p903_p2 }
  0x65   :  { %p906_p5 = pnand %p905_p4, %p899_p1 }
  0x67   :  { %909 = shalt.err (!%p906_p5)
}
  0x68   :  { %s994_s2 = smov 128   ;;  %s995_s17 = smov 8  }
  0x69   :  { %79 = dma.hbm_to_vmem [thread:$0]  %s1229_s5, 512, %s1128_s4, [#allocation9], %s994_s2, %s994_s2, %s995_s17  }
  0x6a   :  { %s996_s21 = smov [#allocation13]   ;;  %s910_s0 = scalar_lea.hbm %s1235_s11, 768 }
  0x6b   :  { %s103_s1 = sshll.u32 %s996_s21, 4  ;;  %p911_p6 = scmp.ne.s32.totalorder %s1235_s11, %s910_s0  ;;  %s104_s1 = int_to_ptr.vmem [resolvable:$true] %s103_s1 }
  0x6c   :  { %p914_p7 = scmp.lt.u32.totalorder %s910_s0, %s1235_s11 }
  0x6e   :  { %p916_p8 = pnand %p914_p7, %p911_p6 }
  0x70   :  { %919 = shalt.err (!%p916_p8)
}
  0x71   :  { %s920_s28 = scalar_lea.vmem %s104_s1, 768  ;;  %p925_p10 = scmp.lt.s32.totalorder %s104_s1, %s104_s1 }
  0x72   :  { %p921_p9 = scmp.ne.s32.totalorder %s104_s1, %s920_s28  ;;  %p926_p11 = scmp.lt.s32.totalorder %s920_s28, %s920_s28 }
  0x74   :  { %p927_p12 = por %p926_p11, %p925_p10 }
  0x76   :  { %p928_p13 = pnand %p927_p12, %p921_p9 }
  0x78   :  { %931 = shalt.err (!%p928_p13)
}
  0x79   :  { %s997_s5 = smov 256   ;;  %s998_s4 = smov 16  }
  0x7a   :  { %109 = dma.hbm_to_vmem [thread:$0]  %s1235_s11, 768, %s104_s1, [#allocation12], %s997_s5, %s997_s5, %s998_s4  }
  0x7b   :  { %976 = dma.done.wait [#allocation3], 16  }
  0x7c   :  { %977 = vsyncadd [#allocation3], 4294967280 }
  0x7d   :  { %978 = dma.done.wait [#allocation6], 80  }
  0x7e   :  { %979 = vsyncadd [#allocation6], 4294967216 }
  0x7f   :  { %980 = dma.done.wait [#allocation9], 528  }
  0x80   :  { %981 = vsyncadd [#allocation9], 4294966768 }
  0x81   :  { %982 = dma.done.wait [#allocation12], 784  }
  0x82   :  { %983 = vsyncadd [#allocation12], 4294966512  ;;  %v999_v0 = vmov 0.0   ;;  %vm1000_vm0 = vmmov 0   ;;  %vm140_vm1 = vcmask 1043456   ;;  %vm136_vm2 = vcmask 31744  }
  0x83   :  { %720 = vmatprep.subr.mxu1 %v999_v0  ;;  %722 = vmatprep.mubr.msk.f32.mxu1 %vm1000_vm0, %v999_v0  ;;  %v134_v1 = vld [vmem:[#allocation5] sm:$0xf]  ;;  %v133_v2 = vld [vmem:[#allocation2] sm:$0x1]  ;;  %v296_v4 = vld [vmem:[#allocation10] sm:$0xff]  ;;  %v1001_v6 = vmov 0.0|0.0  }
  0x84   :  { %738 = vmatprep.mubr.msk.f32.mxu0 %vm1000_vm0, %v999_v0  ;;  %721 = vmatpush3.msk.msra.mxu1 %vm140_vm1, %v134_v1  ;;  %v217_v3 = vld [vmem:[%s1227_s3] sm:$0xff]  ;;  %v297_v5 = vld [vmem:[#allocation10 + $0x8] sm:$0xff]  ;;  %vm219_vm4 = vcmask 64512   ;;  %v218_v19 = vld [vmem:[#allocation8] sm:$0x1]  ;;  %vm301_vm6 = vcmask 261120  }
  0x85   :  { %723 = vmatmul.mubr.msk.f32.vlgmr.msra.gmra.mrb[0].mxu1 %vm136_vm2, %v133_v2  ;;  %725 = vmatprep.subr.mxu1 %v999_v0  ;;  %v752_v7 = vpack.c.bf16 %v297_v5, %v296_v4  ;;  %v135_v8 = vld [vmem:[#allocation7] sm:$0x1]  ;;  %v380_v13 = vld [vmem:[%s1231_s7] sm:$0xf]  ;;  %v537_v31 = vld [vmem:[#allocation13 + $0x8] sm:$0xff]  ;;  %vm558_vm8 = vcmask 1045504  }
  0x86   :  { %727 = vmatprep.mubr.msk.f32.mxu1 %vm1000_vm0, %v999_v0  ;;  %726 = vmatpush3.msra.mxu1 %v217_v3  ;;  %v298_v15 = vld [vmem:[#allocation10 + $0x10] sm:$0xff]  ;;  %v299_v16 = vld [vmem:[#allocation10 + $0x18] sm:$0xff]  ;;  %v536_v34 = vld [vmem:[#allocation13] sm:$0xff]  ;;  %vm378_vm10 = vcmask 516096   ;;  %vm554_vm12 = vcmask 179200   ;;  %s1002_s17 = smov [#allocation14]  }
  0x87   :  { %741 = vmatprep.subr.mxu1 %v999_v0  ;;  %751 = vmatprep.subr.bf16.mxu0 %v1001_v6  ;;  %v755_v17 = vpack.c.bf16 %v299_v16, %v298_v15  ;;  %v458_v18 = vld [vmem:[%s1233_s9] sm:$0xff]  ;;  %v541_v37 = vld [vmem:[#allocation13 + $0x28] sm:$0x3f]  ;;  %v540_v38 = vld [vmem:[#allocation13 + $0x20] sm:$0x3f]  ;;  %s671_s19 = sshll.u32 %s1002_s17, 4  ;;  %s672_s19 = int_to_ptr.vmem [resolvable:$true] %s671_s19 }
  0x88   :  { %753 = vmatpush3.bf16.msra.mxu0 %v752_v7  ;;  %v381_v23 = vld [vmem:[%s1232_s8] sm:$0x1]  ;;  %v539_v32 = vld [vmem:[#allocation13 + $0x18] sm:$0xff]  ;;  %s932_s20 = scalar_lea.vmem %s672_s19, 16  ;;  %s936_s21 = scalar_lea.vmem %s672_s19, 32 }
  0x89   :  { %754 = vmatprep.subr.bf16.mxu0 %v1001_v6  ;;  %v757_v33 = vpack.c.bf16 %v539_v32, %v537_v31  ;;  %v538_v35 = vld [vmem:[#allocation13 + $0x10] sm:$0xff]  ;;  %v300_v39 = vld [vmem:[#allocation11] sm:$0x1]  ;;  %p933_p0 = scmp.ne.s32.totalorder %s672_s19, %s932_s20  ;;  %p937_p1 = scmp.lt.s32.totalorder %s672_s19, %s672_s19 }
  0x8a   :  { %v759_v36 = vpack.c.bf16 %v538_v35, %v536_v34  ;;  %v459_v43 = vld [vmem:[%s1234_s10] sm:$0x1]  ;;  %p938_p2 = scmp.lt.s32.totalorder %s936_s21, %s932_s20 }
  0x8c   :  { %756 = vmatpush3.bf16.msra.mxu0 %v755_v17  ;;  %p939_p3 = por %p938_p2, %p937_p1 }
  0x8d   :  { %758 = vmatprep.subr.bf16.mxu0 %v757_v33 }
  0x8e   :  { %p940_p4 = pnand %p939_p3, %p933_p0 }
 0x158   :  { %v210_v9 = vpop.f32.mrb[0].mxu1 }
 0x159   :  { %v211_v10 = vadd.f32 %v210_v9, %v135_v8  ;;  %v724_v11 = vpop.f32.mrb[1].mxu1 }
 0x15b   :  { %vm214_vm3 = vcmp.gt.f32.partialorder %v211_v10, 0.0  ;;  %v215_v12 = vmul.f32 0.2, %v211_v10 }
 0x15d   :  { %v216_v14 = vsel %vm214_vm3, %v211_v10, %v215_v12 }
 0x15e   :  { %728 = vmatmul.mubr.msk.f32.vlgmr.msra.gmra.mrb[2].mxu1 %vm219_vm4, %v216_v14 }
 0x15f   :  { %742 = vmatpush3.msk.msra.mxu1 %vm140_vm1, %v380_v13  ;;  %743 = vmatprep.mubr.msk.f32.mxu1 %vm1000_vm0, %v999_v0 }
 0x160   :  { %746 = vmatprep.subr.mxu1 %v999_v0 }
 0x162   :  { %744 = vmatmul.mubr.msk.f32.vlgmr.msra.gmra.mrb[4].mxu1 %vm136_vm2, %v133_v2 }
 0x163   :  { %748 = vmatprep.mubr.msk.f32.mxu1 %vm1000_vm0, %v999_v0  ;;  %747 = vmatpush3.msra.mxu1 %v458_v18 }
 0x231   :  { %v289_v20 = vpop.f32.mrb[2].mxu1 }
 0x232   :  { %v290_v21 = vadd.f32 %v289_v20, %v218_v19  ;;  %v729_v22 = vpop.f32.mrb[3].mxu1 }
 0x234   :  { %vm293_vm5 = vcmp.gt.f32.partialorder %v290_v21, 0.0  ;;  %v294_v24 = vmul.f32 0.2, %v290_v21 }
 0x235   :  { %v451_v25 = vpop.f32.mrb[4].mxu1 }
 0x236   :  { %v452_v26 = vadd.f32 %v451_v25, %v381_v23  ;;  %v745_v27 = vpop.f32.mrb[5].mxu1  ;;  %v295_v28 = vsel %vm293_vm5, %v290_v21, %v294_v24 }
 0x237   :  { %739 = vmatmul.mubr.msk.f32.vlgmr.msra.gmra.mrb[0].mxu0 %vm301_vm6, %v295_v28 }
 0x238   :  { %vm455_vm7 = vcmp.gt.f32.partialorder %v452_v26, 0.0  ;;  %v456_v29 = vmul.f32 0.2, %v452_v26  ;;  %629 = vmatprep.mubr.f32.mxu0 %v999_v0  ;;  %760 = vmatpush1.bf16.msra.mxu0 %v759_v36 }
 0x239   :  { %704 = vmatprep.subr.msk.mxu0 %vm558_vm8, %v541_v37 }
 0x23a   :  { %v457_v30 = vsel %vm455_vm7, %v452_v26, %v456_v29 }
 0x23b   :  { %749 = vmatmul.mubr.msk.f32.vlgmr.msra.gmra.mrb[6].mxu1 %vm219_vm4, %v457_v30 }
 0x23c   :  { %705 = vmatpush1.msk.msra.mxu0 %vm558_vm8, %v540_v38 }
 0x30a   :  { %v371_v40 = vpop.f32.mrb[0].mxu0 }
 0x30b   :  { %v372_v41 = vadd.f32 %v371_v40, %v300_v39  ;;  %v740_v42 = vpop.f32.mrb[1].mxu0 }
 0x30d   :  { %vm375_vm9 = vcmp.gt.f32.partialorder %v372_v41, 0.0  ;;  %v376_v44 = vmul.f32 0.2, %v372_v41 }
 0x30e   :  { %v529_v45 = vpop.f32.mrb[6].mxu1 }
 0x30f   :  { %v530_v46 = vadd.f32 %v529_v45, %v459_v43  ;;  %v750_v47 = vpop.f32.mrb[7].mxu1  ;;  %v377_v48 = vsel %vm375_vm9, %v372_v41, %v376_v44 }
 0x310   :  { %379 = vst.msk [vmem:[#allocation14] sm:$0x1] %vm378_vm10, %v377_v48 }
 0x311   :  { %vm533_vm11 = vcmp.gt.f32.partialorder %v530_v46, 0.0  ;;  %v534_v49 = vmul.f32 0.2, %v530_v46 }
 0x313   :  { %v535_v50 = vsel %vm533_vm11, %v530_v46, %v534_v49 }
 0x314   :  { %706 = vmatmul.mubr.msk.f32.vlgmr.msra.gmra.mrb[2].mxu0 %vm554_vm12, %v535_v50 }
 0x315   :  { %943 = shalt.err (!%p940_p4)
}
 0x316   :  { %s944_s30 = scalar_lea.hbm %s1237_s13, 16 }
 0x317   :  { %p945_p5 = scmp.ne.s32.totalorder %s1237_s13, %s944_s30  ;;  %p948_p6 = scmp.lt.u32.totalorder %s944_s30, %s1237_s13 }
 0x319   :  { %p950_p7 = pnand %p948_p6, %p945_p5 }
 0x31b   :  { %953 = shalt.err (!%p950_p7)
}
 0x31c   :  { %674 = dma.vmem_to_hbm [thread:$0]  %s672_s19, 16, %s1237_s13, [#allocation4]   ;;  %v544_v51 = vlaneseq  ;;  %v542_v54 = vld [vmem:[%s1236_s12] sm:$0x3]  ;;  %v1003_v57 = vmov 1966171168  }
 0x31d   :  { %v646_v58 = vunpack.c.l.s4 %v1003_v57  ;;  %s1004_s13 = smov [#allocation15]  }
 0x31e   :  { %v545_v52 = vshrl.u32 %v544_v51, 7  ;;  %s681_s12 = sshll.u32 %s1004_s13, 4  ;;  %vm662_vm15 = vcmp.lt.s32.totalorder %v544_v51, 256  ;;  %s682_s12 = int_to_ptr.vmem [resolvable:$true] %s681_s12 }
 0x31f   :  { %v647_v63 = vunpack.c.0.s8 %v646_v58  ;;  %s954_s4 = scalar_lea.vmem %s682_s12, 32  ;;  %p959_p9 = scmp.lt.s32.totalorder %s682_s12, %s682_s12 }
 0x320   :  { %v546_v53 = vsub.s32 0, %v545_v52  ;;  %v550_v55 = vsub.s32 1, %v545_v52  ;;  %p955_p8 = scmp.ne.s32.totalorder %s682_s12, %s954_s4  ;;  %p960_p10 = scmp.lt.s32.totalorder %s954_s4, %s954_s4 }
 0x321   :  { %v650_v4 = vsub.s32 %v647_v63, %v545_v52 }
 0x322   :  { %v547_v56 = vrot.slane %v542_v54, %v546_v53  ;;  %v551_v59 = vrot.slane %v542_v54, %v550_v55  ;;  %p961_p11 = por %p960_p10, %p959_p9 }
 0x324   :  { %p962_p12 = pnand %p961_p11, %p955_p8 }
 0x3e7   :  { %v631_v60 = vpop.f32.mrb[2].mxu0 }
 0x3e8   :  { %v632_v61 = vadd.f32 %v631_v60, %v547_v56  ;;  %v633_v62 = vpop.f32.mrb[3].mxu0 }
 0x3e9   :  { %v634_v0 = vadd.f32 %v633_v62, %v551_v59 }
 0x3ea   :  { %vm636_vm13 = vcmp.gt.f32.partialorder %v632_v61, 0.0  ;;  %v638_v1 = vmul.f32 0.2, %v632_v61 }
 0x3eb   :  { %vm637_vm14 = vcmp.gt.f32.partialorder %v634_v0, 0.0  ;;  %v639_v2 = vmul.f32 0.2, %v634_v0 }
 0x3ec   :  { %v640_v3 = vsel %vm636_vm13, %v632_v61, %v638_v1 }
 0x3ed   :  { %v641_v5 = vsel %vm637_vm14, %v634_v0, %v639_v2 }
 0x3ee   :  { %v644_v6 = vcombine.low %v640_v3, %v641_v5 }
 0x3f0   :  { %v651_v7 = vrot.slane %v644_v6, %v650_v4 }
 0x3f2   :  { %v658_v8 = vrot.slane %v651_v7, %v650_v4 }
 0x3f4   :  { %664 = vst.msk [vmem:[#allocation15] sm:$0x3] %vm662_vm15, %v658_v8 }
 0x3f5   :  { %965 = shalt.err (!%p962_p12)
}
 0x3f6   :  { %s966_s11 = scalar_lea.hbm %s1238_s14, 32 }
 0x3f7   :  { %p967_p13 = scmp.ne.s32.totalorder %s1238_s14, %s966_s11  ;;  %p970_p0 = scmp.lt.u32.totalorder %s966_s11, %s1238_s14 }
 0x3f9   :  { %p972_p1 = pnand %p970_p0, %p967_p13 }
 0x3fb   :  { %975 = shalt.err (!%p972_p1)
}
 0x3fc   :  { %684 = dma.vmem_to_hbm [thread:$0]  %s682_s12, 32, %s1238_s14, [#allocation16]  }
 0x3fd   :  { %984 = dma.done.wait [#allocation4], 16  }
 0x3fe   :  { %985 = vsyncadd [#allocation4], 4294967280 }
 0x3ff   :  { %986 = dma.done.wait [#allocation16], 32  }
 0x400   :  { %987 = vsyncadd [#allocation16], 4294967264 }
 0x401   :  { %691 = vsyncpa [#allocation3], 1 }
 0x402   :  { %692 = vsyncpa [#allocation6], 1 }
 0x403   :  { %693 = vsyncpa [#allocation9], 1 }
 0x404   :  { %694 = vsyncpa [#allocation12], 1 }
 0x405   :  { %695 = vsyncpa [#allocation4], 1 }
 0x406   :  { %696 = vsyncpa [#allocation16], 1 }

</bundles_post_ra>
